<compile_context>
chip_gen: v7x
topology: tpu7x:2x2x1
jax: 0.10.0
libtpu: 0.0.40
codegen_flags: <defaults>
</compile_context>

<pallas_src>
import jax
import jax.numpy as jnp
from jax.experimental import pallas as pl
from jax.experimental.pallas import tpu as pltpu


# --------------------------------------------------------------------------
# Kernel
# --------------------------------------------------------------------------
def mlp_kernel(x_ref, w0t_ref, w1t_ref, v2_ref, out_ref):
    # In-kernel f32 -> bf16 cast of the activation tile.
    x = x_ref[...].astype(jnp.bfloat16)                                 # (TM, D)

    # Two canonical (M,K)x(K,N) matmuls on the MXU, f32 accumulation.
    h = jnp.dot(x, w0t_ref[...], preferred_element_type=jnp.float32)
    h = h.astype(jnp.bfloat16)
    h2 = jnp.dot(h, w1t_ref[...], preferred_element_type=jnp.float32)  # (TM, D) f32

    # Folded layers 2+3 and global sum:
    #   contribution = sum_b sum_k h2[b,k] * v2[k]
    # Reduce the batch dim down to 8 sublanes (cheap vreg adds), scale by the
    # precomputed v2; the wrapper sums the small (8, D) residue.
    tm, d = h2.shape
    part8 = jnp.sum(h2.reshape(tm // 8, 8, d), axis=0)                 # (8, D) f32
    out_ref[...] = part8 * v2_ref[...]                                 # (8, D)


# --------------------------------------------------------------------------
# Hardware queries (best-effort; safe fallbacks)
# --------------------------------------------------------------------------
def _tensorcores_per_chip():
    try:
        info = pltpu.get_tpu_info()
        for attr in ("num_cores", "num_tensorcores", "tensorcore_count",
                     "cores_per_chip"):
            v = getattr(info, attr, None)
            if isinstance(v, int) and v > 0:
                return v
    except Exception:
        pass
    try:
        dk = jax.devices()[0].device_kind.lower()
        if "v7" in dk:          # v7x: 2 TensorCores per chip
            return 2
    except Exception:
        pass
    return 1                    # v5e / v6e: single TensorCore


def _vmem_capacity_bytes():
    try:
        cap = getattr(pltpu.get_tpu_info(), "vmem_capacity_bytes", None)
        if cap:
            return int(cap)
    except Exception:
        pass
    return 64 * 1024 * 1024     # conservative (v7x per-TC VMEM)


def _choose_block_m(batch, num_cores):
    # Prefer one block per TensorCore; prefer bigger blocks (up to 1024 rows)
    # over more grid steps, since each step carries ~0.35 us fixed overhead.
    bm = pl.cdiv(batch, num_cores)
    bm = ((bm + 7) // 8) * 8            # sublane multiple (reshape needs %8==0)
    bm = max(8, min(bm, 1024))
    return bm


# --------------------------------------------------------------------------
# Wrapper
# --------------------------------------------------------------------------
def mlp_forward(x, weights, *, block_m=None):
    assert len(weights) == 4
    batch, dim = x.shape
    # Keep the output / weight blocks lane-dense (last dim multiple of 128).
    assert dim % 128 == 0, "dim must be a multiple of 128"

    num_cores = _tensorcores_per_chip()
    if block_m is None:
        block_m = _choose_block_m(batch, num_cores)
    assert block_m % 8 == 0, "block_m must be a multiple of 8"

    padded = pl.cdiv(batch, block_m) * block_m
    if padded != batch:
        # Exact only because every layer is bias-free and purely linear and the
        # loss is a plain sum: zero-padded rows contribute exactly 0.
        x = jnp.pad(x, ((0, padded - batch), (0, 0)))
    grid_m = padded // block_m

    # One-time, grid-invariant weight prep (transpose + bf16 cast fuse into a
    # single small XLA op per weight; amortized over every block).
    w0t = weights[0].T.astype(jnp.bfloat16)                  # (D, D)
    w1t = weights[1].T.astype(jnp.bfloat16)                  # (D, D)
    # v2 = W2.T @ colsum(W3), f32, shape (1, D).
    v2 = (weights[2].astype(jnp.float32).T
          @ jnp.sum(weights[3].astype(jnp.float32), axis=0)).reshape(1, dim)

    # Grid-invariant weights don't need double buffering; drop to a single
    # buffer once they'd eat a meaningful VMEM fraction (matters on v7x 64 MiB).
    single_buffer_weights = (2 * (2 * dim * dim * 2)) > (8 * 1024 * 1024)
    wkw = {"pipeline_mode": pl.Buffered(1)} if single_buffer_weights else {}
    weight_bufs = 1 if single_buffer_weights else 2

    # VMEM budget: x tile (f32, double-buffered) + resident bf16 weights +
    # v2 + (8, D) f32 output, with 2x headroom, capped by physical capacity.
    vmem_need = (2 * block_m * dim * 4
                 + weight_bufs * 2 * dim * dim * 2
                 + 2 * dim * 4
                 + 2 * 8 * dim * 4)
    vmem_limit = min(max(2 * vmem_need, 32 * 1024 * 1024),
                     int(0.75 * _vmem_capacity_bytes()))

    cost = pl.CostEstimate(
        flops=2 * 2 * padded * dim * dim + 2 * padded * dim,
        transcendentals=0,
        bytes_accessed=(padded * dim * 4          # x (f32, read once)
                        + 2 * dim * dim * 2       # w0t, w1t (bf16)
                        + dim * 4                 # v2 (f32)
                        + grid_m * 8 * dim * 4),  # partial-sum output (f32)
    )

    partials = pl.pallas_call(
        mlp_kernel,
        out_shape=jax.ShapeDtypeStruct((grid_m * 8, dim), jnp.float32),
        grid_spec=pltpu.PrefetchScalarGridSpec(
            num_scalar_prefetch=0,
            grid=(grid_m,),
            in_specs=[
                pl.BlockSpec((block_m, dim), lambda i: (i, 0)),        # x tile (f32)
                pl.BlockSpec((dim, dim), lambda i: (0, 0), **wkw),     # w0.T (resident)
                pl.BlockSpec((dim, dim), lambda i: (0, 0), **wkw),     # w1.T (resident)
                pl.BlockSpec((1, dim), lambda i: (0, 0)),              # v2
            ],
            out_specs=pl.BlockSpec((8, dim), lambda i: (i, 0)),
        ),
        compiler_params=pltpu.CompilerParams(
            dimension_semantics=("parallel",),     # shards M blocks across TCs (v7x)
            vmem_limit_bytes=vmem_limit,
        ),
        cost_estimate=cost,
    )(x, w0t, w1t, v2)

    return jnp.sum(partials)


# --------------------------------------------------------------------------
# Self-test
# --------------------------------------------------------------------------
if __name__ == "__main__":
    batch, dim, nlayers = 256, 128, 4

    key = jax.random.PRNGKey(0)
    keys = jax.random.split(key, nlayers + 1)

    x = jax.random.normal(keys[0], (batch, dim), dtype=jnp.float32)
    bound = 1.0 / (dim ** 0.5)
    weights = [
        jax.random.uniform(keys[i + 1], (dim, dim), minval=-bound, maxval=bound,
                           dtype=jnp.float32)
        for i in range(nlayers)
    ]

    loss = jax.jit(mlp_forward)(x, weights)
    jax.block_until_ready(loss)

    # Precision-matched reference in plain JAX (same bf16 operands for the two
    # MXU matmuls, f32 accumulation, same algebraic fold of layers 2+3 + sum).
    # Note: bf16 operands change numerics vs a literal fp32 PyTorch MLP; error
    # grows with dim.
    h = x.astype(jnp.bfloat16)
    h = jnp.dot(h, weights[0].T.astype(jnp.bfloat16),
                preferred_element_type=jnp.float32).astype(jnp.bfloat16)
    h2 = jnp.dot(h, weights[1].T.astype(jnp.bfloat16),
                 preferred_element_type=jnp.float32)
    v2_ref = weights[2].T @ jnp.sum(weights[3], axis=0)
    ref_loss = jnp.sum(jnp.sum(h2, axis=0) * v2_ref)

    assert bool(jnp.isfinite(loss)), loss
    assert jnp.allclose(loss, ref_loss, rtol=5e-3, atol=5e-2), (loss, ref_loss)

    print("KERNEL_OK")
</pallas_src>

<mosaic_0001>
module attributes {stable_mosaic.version = 11 : i64} {
  func.func @mlp_kernel(%arg0: i32, %arg1: memref<256x128xf32, #tpu.memory_space<vmem>>, %arg2: memref<128x128xbf16, #tpu.memory_space<vmem>>, %arg3: memref<128x128xbf16, #tpu.memory_space<vmem>>, %arg4: memref<1x128xf32, #tpu.memory_space<vmem>>, %arg5: memref<8x128xf32, #tpu.memory_space<vmem>>) attributes {dimension_semantics = [#tpu.dimension_semantics<parallel>], iteration_bounds = array<i64: 1>, scalar_prefetch = 0 : i64, scratch_operands = 0 : i64, tpu.core_type = #tpu.core_type<tc>, window_params = [{transform_indices = @transform_0, window_bounds = array<i64: 256, 128>}, {pipeline_mode = #tpu.pipeline_mode<synchronous>, transform_indices = @transform_1, window_bounds = array<i64: 128, 128>}, {pipeline_mode = #tpu.pipeline_mode<synchronous>, transform_indices = @transform_2, window_bounds = array<i64: 128, 128>}, {pipeline_mode = #tpu.pipeline_mode<synchronous>, transform_indices = @transform_3, window_bounds = array<i64: 1, 128>}, {transform_indices = @transform_4, window_bounds = array<i64: 8, 128>}]} {
    %c0 = arith.constant 0 : index
    %c0_0 = arith.constant 0 : index
    %0 = vector.load %arg1[%c0, %c0_0] : memref<256x128xf32, #tpu.memory_space<vmem>>, vector<256x128xf32>
    %1 = arith.truncf %0 : vector<256x128xf32> to vector<256x128xbf16>
    %c0_1 = arith.constant 0 : index
    %c0_2 = arith.constant 0 : index
    %2 = vector.load %arg2[%c0_1, %c0_2] : memref<128x128xbf16, #tpu.memory_space<vmem>>, vector<128x128xbf16>
    %cst = arith.constant dense<0.000000e+00> : vector<256x128xf32>
    %3 = tpu.matmul %1, %2, %cst {dimension_numbers = #tpu.dot_dimension_numbers<[1], [0], [0], [1], [0, 0, 1, 1], [], []>} : vector<256x128xbf16>, vector<128x128xbf16>, vector<256x128xf32> -> vector<256x128xf32>
    %4 = arith.truncf %3 : vector<256x128xf32> to vector<256x128xbf16>
    %c0_3 = arith.constant 0 : index
    %c0_4 = arith.constant 0 : index
    %5 = vector.load %arg3[%c0_3, %c0_4] : memref<128x128xbf16, #tpu.memory_space<vmem>>, vector<128x128xbf16>
    %cst_5 = arith.constant dense<0.000000e+00> : vector<256x128xf32>
    %6 = tpu.matmul %4, %5, %cst_5 {dimension_numbers = #tpu.dot_dimension_numbers<[1], [0], [0], [1], [0, 0, 1, 1], [], []>} : vector<256x128xbf16>, vector<128x128xbf16>, vector<256x128xf32> -> vector<256x128xf32>
    %7 = vector.shape_cast %6 : vector<256x128xf32> to vector<32x8x128xf32>
    %cst_6 = arith.constant dense<0.000000e+00> : vector<8x128xf32>
    %8 = vector.multi_reduction <add>, %7, %cst_6 [0] : vector<32x8x128xf32> to vector<8x128xf32>
    %c0_7 = arith.constant 0 : index
    %c0_8 = arith.constant 0 : index
    %9 = vector.load %arg4[%c0_7, %c0_8] : memref<1x128xf32, #tpu.memory_space<vmem>>, vector<1x128xf32>
    %10 = vector.broadcast %9 : vector<1x128xf32> to vector<8x128xf32>
    %11 = arith.mulf %8, %10 : vector<8x128xf32>
    %c0_9 = arith.constant 0 : index
    %c0_10 = arith.constant 0 : index
    %12 = vector.load %arg5[%c0_9, %c0_10] : memref<8x128xf32, #tpu.memory_space<vmem>>, vector<8x128xf32>
    tpu.vector_store %arg5[%c0_9, %c0_10], %11 {strides = array<i32>} : memref<8x128xf32, #tpu.memory_space<vmem>>, vector<8x128xf32>,
    return
  }
  func.func @transform_0(%arg0: i32) -> (i32, i32) {
    %c0_i32 = arith.constant 0 : i32
    %c0_i32_0 = arith.constant 0 : i32
    return %arg0, %c0_i32 : i32, i32
  }
  func.func @transform_1(%arg0: i32) -> (i32, i32) {
    %c0_i32 = arith.constant 0 : i32
    %c0_i32_0 = arith.constant 0 : i32
    %c0_i32_1 = arith.constant 0 : i32
    return %c0_i32, %c0_i32_0 : i32, i32
  }
  func.func @transform_2(%arg0: i32) -> (i32, i32) {
    %c0_i32 = arith.constant 0 : i32
    %c0_i32_0 = arith.constant 0 : i32
    %c0_i32_1 = arith.constant 0 : i32
    return %c0_i32, %c0_i32_0 : i32, i32
  }
  func.func @transform_3(%arg0: i32) -> (i32, i32) {
    %c0_i32 = arith.constant 0 : i32
    %c0_i32_0 = arith.constant 0 : i32
    %c0_i32_1 = arith.constant 0 : i32
    return %c0_i32, %c0_i32_0 : i32, i32
  }
  func.func @transform_4(%arg0: i32) -> (i32, i32) {
    %c0_i32 = arith.constant 0 : i32
    %c0_i32_0 = arith.constant 0 : i32
    return %arg0, %c0_i32 : i32, i32
  }
}

</mosaic_0001>

<bundles_post_ra>
// kernel: mlp_forward.1
= control target key start
LH: loop header
LB: loop body
LE: loop exit
PB: predicated region body
PF: predicated region fallthrough
CT: control target
= control target key end

     0   :  { %s928_s1 = inlined_call_operand.vmem [shape: bf16[128,128], index: 1, kind: input, shape index: {}]   ;;  %s929_s0 = inlined_call_operand.vmem [shape: f32[256,128], index: 0, kind: input, shape index: {}]   ;;  %s930_s2 = inlined_call_operand.vmem [shape: bf16[128,128], index: 2, kind: input, shape index: {}]   ;;  %s931_s3 = inlined_call_operand.vmem [shape: f32[1,128], index: 3, kind: input, shape index: {}]   ;;  %s932_s4 = inlined_call_operand.vmem [shape: f32[8,128], index: 4, kind: output, shape index: {}]  }
   0x1   :  { %v737_v0 = vld [vmem:[%s928_s1] sm:$0xff]   ;;  %v738_v1 = vld [vmem:[%s928_s1 + $0x8] sm:$0xff]   ;;  %v739_v2 = vld [vmem:[%s928_s1 + $0x10] sm:$0xff]  }
   0x2   :  { %641 = vmatprep.subr.bf16.mxu0 %v737_v0  ;;  %v740_v3 = vld [vmem:[%s928_s1 + $0x18] sm:$0xff]   ;;  %v18_v4 = vld [vmem:[%s929_s0] sm:$0xff]  ;;  %v19_v5 = vld [vmem:[%s929_s0 + $0x8] sm:$0xff] }
   0x3   :  { %642 = vmatpush3.bf16.msra.mxu0 %v737_v0  ;;  %v50_v6 = vpack.c.bf16 %v19_v5, %v18_v4  ;;  %v741_v7 = vld [vmem:[%s928_s1 + $0x20] sm:$0xff]   ;;  %v742_v8 = vld [vmem:[%s928_s1 + $0x28] sm:$0xff]   ;;  %v743_v9 = vld [vmem:[%s928_s1 + $0x30] sm:$0xff]  }
   0x4   :  { %643 = vmatprep.subr.bf16.mxu0 %v738_v1  ;;  %v745_v10 = vld [vmem:[%s930_s2] sm:$0xff]   ;;  %v746_v11 = vld [vmem:[%s930_s2 + $0x8] sm:$0xff]   ;;  %v747_v12 = vld [vmem:[%s930_s2 + $0x10] sm:$0xff]  }
   0x5   :  { %657 = vmatprep.mubr.bf16.mxu0 %v50_v6  ;;  %689 = vmatprep.subr.bf16.mxu1 %v745_v10  ;;  %v744_v13 = vld [vmem:[%s928_s1 + $0x38] sm:$0xff]   ;;  %v20_v14 = vld [vmem:[%s929_s0 + $0x10] sm:$0xff]  ;;  %v22_v17 = vld [vmem:[%s929_s0 + $0x20] sm:$0xff] }
   0x6   :  { %690 = vmatpush3.bf16.msra.mxu1 %v745_v10  ;;  %v21_v15 = vld [vmem:[%s929_s0 + $0x18] sm:$0xff]  ;;  %v23_v18 = vld [vmem:[%s929_s0 + $0x28] sm:$0xff]  ;;  %v749_v21 = vld [vmem:[%s930_s2 + $0x20] sm:$0xff]  }
   0x7   :  { %644 = vmatpush3.bf16.msra.mxu0 %v738_v1  ;;  %691 = vmatprep.subr.bf16.mxu1 %v746_v11  ;;  %v748_v16 = vld [vmem:[%s930_s2 + $0x18] sm:$0xff]   ;;  %v51_v19 = vpack.c.bf16 %v21_v15, %v20_v14  ;;  %v52_v20 = vpack.c.bf16 %v23_v18, %v22_v17  ;;  %v24_v22 = vld [vmem:[%s929_s0 + $0x30] sm:$0xff]  ;;  %v750_v24 = vld [vmem:[%s930_s2 + $0x28] sm:$0xff]  }
   0x8   :  { %645 = vmatprep.subr.bf16.mxu0 %v739_v2  ;;  %v25_v23 = vld [vmem:[%s929_s0 + $0x38] sm:$0xff]  ;;  %v26_v25 = vld [vmem:[%s929_s0 + $0x40] sm:$0xff]  ;;  %v27_v26 = vld [vmem:[%s929_s0 + $0x48] sm:$0xff] }
   0x9   :  { %v53_v27 = vpack.c.bf16 %v25_v23, %v24_v22  ;;  %v54_v28 = vpack.c.bf16 %v27_v26, %v26_v25  ;;  %v751_v29 = vld [vmem:[%s930_s2 + $0x30] sm:$0xff]   ;;  %v29_v31 = vld [vmem:[%s929_s0 + $0x58] sm:$0xff]  ;;  %v30_v32 = vld [vmem:[%s929_s0 + $0x60] sm:$0xff] }
   0xa   :  { %692 = vmatpush3.bf16.msra.mxu1 %v746_v11  ;;  %v28_v30 = vld [vmem:[%s929_s0 + $0x50] sm:$0xff]  ;;  %v31_v33 = vld [vmem:[%s929_s0 + $0x68] sm:$0xff]  ;;  %v33_v37 = vld [vmem:[%s929_s0 + $0x78] sm:$0xff] }
   0xb   :  { %646 = vmatpush3.bf16.msra.mxu0 %v739_v2  ;;  %693 = vmatprep.subr.bf16.mxu1 %v747_v12  ;;  %v55_v34 = vpack.c.bf16 %v29_v31, %v28_v30  ;;  %v56_v35 = vpack.c.bf16 %v31_v33, %v30_v32  ;;  %v32_v36 = vld [vmem:[%s929_s0 + $0x70] sm:$0xff]  ;;  %v34_v38 = vld [vmem:[%s929_s0 + $0x80] sm:$0xff]  ;;  %v35_v39 = vld [vmem:[%s929_s0 + $0x88] sm:$0xff] }
   0xc   :  { %647 = vmatprep.subr.bf16.mxu0 %v740_v3  ;;  %v57_v40 = vpack.c.bf16 %v33_v37, %v32_v36  ;;  %v58_v41 = vpack.c.bf16 %v35_v39, %v34_v38  ;;  %v36_v42 = vld [vmem:[%s929_s0 + $0x90] sm:$0xff]  ;;  %v37_v43 = vld [vmem:[%s929_s0 + $0x98] sm:$0xff]  ;;  %v38_v44 = vld [vmem:[%s929_s0 + $0xa0] sm:$0xff] }
   0xd   :  { %v39_v45 = vld [vmem:[%s929_s0 + $0xa8] sm:$0xff]  ;;  %v59_v46 = vpack.c.bf16 %v37_v43, %v36_v42  ;;  %v40_v48 = vld [vmem:[%s929_s0 + $0xb0] sm:$0xff]  ;;  %v41_v49 = vld [vmem:[%s929_s0 + $0xb8] sm:$0xff] }
   0xe   :  { %694 = vmatpush3.bf16.msra.mxu1 %v747_v12  ;;  %v60_v47 = vpack.c.bf16 %v39_v45, %v38_v44  ;;  %v42_v50 = vld [vmem:[%s929_s0 + $0xc0] sm:$0xff]  ;;  %v43_v51 = vld [vmem:[%s929_s0 + $0xc8] sm:$0xff]  ;;  %v61_v52 = vpack.c.bf16 %v41_v49, %v40_v48  ;;  %v44_v54 = vld [vmem:[%s929_s0 + $0xd0] sm:$0xff] }
   0xf   :  { %648 = vmatpush3.bf16.msra.mxu0 %v740_v3  ;;  %695 = vmatprep.subr.bf16.mxu1 %v748_v16  ;;  %v62_v53 = vpack.c.bf16 %v43_v51, %v42_v50  ;;  %v45_v55 = vld [vmem:[%s929_s0 + $0xd8] sm:$0xff]  ;;  %v46_v56 = vld [vmem:[%s929_s0 + $0xe0] sm:$0xff]  ;;  %v47_v57 = vld [vmem:[%s929_s0 + $0xe8] sm:$0xff] }
  0x10   :  { %649 = vmatprep.subr.bf16.mxu0 %v741_v7  ;;  %v63_v58 = vpack.c.bf16 %v45_v55, %v44_v54  ;;  %v64_v59 = vpack.c.bf16 %v47_v57, %v46_v56  ;;  %v48_v60 = vld [vmem:[%s929_s0 + $0xf0] sm:$0xff]  ;;  %v49_v61 = vld [vmem:[%s929_s0 + $0xf8] sm:$0xff] }
  0x11   :  { %v65_v62 = vpack.c.bf16 %v49_v61, %v48_v60  ;;  %v752_v63 = vld [vmem:[%s930_s2 + $0x38] sm:$0xff]  }
  0x12   :  { %696 = vmatpush3.bf16.msra.mxu1 %v748_v16 }
  0x13   :  { %650 = vmatpush3.bf16.msra.mxu0 %v741_v7  ;;  %697 = vmatprep.subr.bf16.mxu1 %v749_v21 }
  0x14   :  { %651 = vmatprep.subr.bf16.mxu0 %v742_v8 }
  0x16   :  { %698 = vmatpush3.bf16.msra.mxu1 %v749_v21 }
  0x17   :  { %652 = vmatpush3.bf16.msra.mxu0 %v742_v8  ;;  %699 = vmatprep.subr.bf16.mxu1 %v750_v24 }
  0x18   :  { %653 = vmatprep.subr.bf16.mxu0 %v743_v9 }
  0x1a   :  { %700 = vmatpush3.bf16.msra.mxu1 %v750_v24 }
  0x1b   :  { %654 = vmatpush3.bf16.msra.mxu0 %v743_v9  ;;  %701 = vmatprep.subr.bf16.mxu1 %v751_v29 }
  0x1c   :  { %655 = vmatprep.subr.bf16.mxu0 %v744_v13 }
  0x1e   :  { %702 = vmatpush3.bf16.msra.mxu1 %v751_v29 }
  0x1f   :  { %656 = vmatpush3.bf16.msra.mxu0 %v744_v13  ;;  %703 = vmatprep.subr.bf16.mxu1 %v752_v63 }
  0x22   :  { %658 = vmatmul.mubr.bf16.vlgmr.msra.gmra.mrb[0].mxu0 %v51_v19  ;;  %704 = vmatpush3.bf16.msra.mxu1 %v752_v63 }
  0x23   :  { %661 = vmatprep.mubr.bf16.mxu0 %v52_v20 }
  0x2a   :  { %662 = vmatmul.mubr.bf16.gmra.mrb[4].mxu0 %v53_v27 }
  0x2b   :  { %665 = vmatprep.mubr.bf16.mxu0 %v54_v28 }
  0x32   :  { %666 = vmatmul.mubr.bf16.gmra.mrb[8].mxu0 %v55_v34 }
  0x33   :  { %669 = vmatprep.mubr.bf16.mxu0 %v56_v35 }
  0x3a   :  { %670 = vmatmul.mubr.bf16.gmra.mrb[12].mxu0 %v57_v40 }
  0x3b   :  { %673 = vmatprep.mubr.bf16.mxu0 %v58_v41 }
  0x42   :  { %674 = vmatmul.mubr.bf16.gmra.mrb[16].mxu0 %v59_v46 }
  0x43   :  { %677 = vmatprep.mubr.bf16.mxu0 %v60_v47 }
  0x4a   :  { %678 = vmatmul.mubr.bf16.gmra.mrb[20].mxu0 %v61_v52 }
  0x4b   :  { %681 = vmatprep.mubr.bf16.mxu0 %v62_v53 }
  0x52   :  { %682 = vmatmul.mubr.bf16.gmra.mrb[24].mxu0 %v63_v58 }
  0x53   :  { %685 = vmatprep.mubr.bf16.mxu0 %v64_v59 }
  0x5a   :  { %686 = vmatmul.mubr.bf16.gmra.mrb[28].mxu0 %v65_v62 }
  0xf5   :  { %v659_v0 = vpop.f32.mrb[0].mxu0 }
  0xf6   :  { %v164_v1 = vpop.f32.mrb[1].mxu0 }
  0xf7   :  { %v660_v2 = vpop.f32.mrb[2].mxu0 }
  0xf8   :  { %v292_v3 = vpack.c.bf16 %v660_v2, %v659_v0  ;;  %v167_v4 = vpop.f32.mrb[3].mxu0 }
  0xf9   :  { %v291_v5 = vpack.c.bf16 %v167_v4, %v164_v1 }
  0xfb   :  { %705 = vmatprep.mubr.bf16.mxu1 %v291_v5 }
  0xfc   :  { %706 = vmatmul.mubr.bf16.vlgmr.msra.gmra.mrb[0].mxu1 %v292_v3 }
  0xfd   :  { %v663_v6 = vpop.f32.mrb[4].mxu0 }
  0xfe   :  { %v180_v7 = vpop.f32.mrb[5].mxu0 }
  0xff   :  { %v664_v8 = vpop.f32.mrb[6].mxu0 }
 0x100   :  { %v294_v9 = vpack.c.bf16 %v664_v8, %v663_v6  ;;  %v183_v10 = vpop.f32.mrb[7].mxu0 }
 0x101   :  { %v293_v11 = vpack.c.bf16 %v183_v10, %v180_v7 }
 0x103   :  { %709 = vmatprep.mubr.bf16.mxu1 %v293_v11 }
 0x104   :  { %710 = vmatmul.mubr.bf16.gmra.mrb[4].mxu1 %v294_v9 }
 0x105   :  { %v667_v12 = vpop.f32.mrb[8].mxu0 }
 0x106   :  { %v196_v13 = vpop.f32.mrb[9].mxu0 }
 0x107   :  { %v668_v14 = vpop.f32.mrb[10].mxu0 }
 0x108   :  { %v296_v15 = vpack.c.bf16 %v668_v14, %v667_v12  ;;  %v199_v16 = vpop.f32.mrb[11].mxu0 }
 0x109   :  { %v295_v17 = vpack.c.bf16 %v199_v16, %v196_v13 }
 0x10b   :  { %713 = vmatprep.mubr.bf16.mxu1 %v295_v17 }
 0x10c   :  { %714 = vmatmul.mubr.bf16.gmra.mrb[8].mxu1 %v296_v15 }
 0x10d   :  { %v671_v18 = vpop.f32.mrb[12].mxu0 }
 0x10e   :  { %v212_v19 = vpop.f32.mrb[13].mxu0 }
 0x10f   :  { %v672_v20 = vpop.f32.mrb[14].mxu0 }
 0x110   :  { %v298_v21 = vpack.c.bf16 %v672_v20, %v671_v18  ;;  %v215_v22 = vpop.f32.mrb[15].mxu0 }
 0x111   :  { %v297_v23 = vpack.c.bf16 %v215_v22, %v212_v19 }
 0x113   :  { %717 = vmatprep.mubr.bf16.mxu1 %v297_v23 }
 0x114   :  { %718 = vmatmul.mubr.bf16.gmra.mrb[12].mxu1 %v298_v21 }
 0x115   :  { %v675_v24 = vpop.f32.mrb[16].mxu0 }
 0x116   :  { %v228_v25 = vpop.f32.mrb[17].mxu0 }
 0x117   :  { %v676_v26 = vpop.f32.mrb[18].mxu0 }
 0x118   :  { %v300_v27 = vpack.c.bf16 %v676_v26, %v675_v24  ;;  %v231_v28 = vpop.f32.mrb[19].mxu0 }
 0x119   :  { %v299_v29 = vpack.c.bf16 %v231_v28, %v228_v25 }
 0x11b   :  { %721 = vmatprep.mubr.bf16.mxu1 %v299_v29 }
 0x11c   :  { %722 = vmatmul.mubr.bf16.gmra.mrb[16].mxu1 %v300_v27 }
 0x11d   :  { %v679_v30 = vpop.f32.mrb[20].mxu0 }
 0x11e   :  { %v244_v31 = vpop.f32.mrb[21].mxu0 }
 0x11f   :  { %v680_v32 = vpop.f32.mrb[22].mxu0 }
 0x120   :  { %v302_v33 = vpack.c.bf16 %v680_v32, %v679_v30  ;;  %v247_v34 = vpop.f32.mrb[23].mxu0 }
 0x121   :  { %v301_v35 = vpack.c.bf16 %v247_v34, %v244_v31 }
 0x123   :  { %725 = vmatprep.mubr.bf16.mxu1 %v301_v35 }
 0x124   :  { %726 = vmatmul.mubr.bf16.gmra.mrb[20].mxu1 %v302_v33 }
 0x125   :  { %v683_v36 = vpop.f32.mrb[24].mxu0 }
 0x126   :  { %v260_v37 = vpop.f32.mrb[25].mxu0 }
 0x127   :  { %v684_v38 = vpop.f32.mrb[26].mxu0 }
 0x128   :  { %v304_v39 = vpack.c.bf16 %v684_v38, %v683_v36  ;;  %v263_v40 = vpop.f32.mrb[27].mxu0 }
 0x129   :  { %v303_v41 = vpack.c.bf16 %v263_v40, %v260_v37 }
 0x12b   :  { %729 = vmatprep.mubr.bf16.mxu1 %v303_v41 }
 0x12c   :  { %730 = vmatmul.mubr.bf16.gmra.mrb[24].mxu1 %v304_v39 }
 0x12d   :  { %v687_v42 = vpop.f32.mrb[28].mxu0 }
 0x12e   :  { %v276_v43 = vpop.f32.mrb[29].mxu0 }
 0x12f   :  { %v688_v44 = vpop.f32.mrb[30].mxu0 }
 0x130   :  { %v306_v45 = vpack.c.bf16 %v688_v44, %v687_v42  ;;  %v279_v46 = vpop.f32.mrb[31].mxu0 }
 0x131   :  { %v305_v47 = vpack.c.bf16 %v279_v46, %v276_v43  ;;  %v592_v46 = vld [vmem:[%s931_s3] ss:$0 sm:$0xff] }
 0x133   :  { %733 = vmatprep.mubr.bf16.mxu1 %v305_v47 }
 0x134   :  { %734 = vmatmul.mubr.bf16.gmra.mrb[28].mxu1 %v306_v45 }
 0x1cf   :  { %v707_v48 = vpop.f32.mrb[0].mxu1 }
 0x1d0   :  { %v405_v49 = vpop.f32.mrb[1].mxu1 }
 0x1d1   :  { %v708_v50 = vpop.f32.mrb[2].mxu1 }
 0x1d2   :  { %v408_v51 = vpop.f32.mrb[3].mxu1 }
 0x1d3   :  { %v532_v52 = vadd.f32 %v408_v51, %v405_v49 }
 0x1d5   :  { %v533_v53 = vadd.f32 %v707_v48, %v532_v52 }
 0x1d7   :  { %v711_v54 = vpop.f32.mrb[4].mxu1  ;;  %v534_v55 = vadd.f32 %v708_v50, %v533_v53 }
 0x1d8   :  { %v421_v56 = vpop.f32.mrb[5].mxu1 }
 0x1d9   :  { %v535_v57 = vadd.f32 %v534_v55, %v421_v56  ;;  %v712_v58 = vpop.f32.mrb[6].mxu1 }
 0x1da   :  { %v424_v59 = vpop.f32.mrb[7].mxu1 }
 0x1db   :  { %v536_v60 = vadd.f32 %v535_v57, %v424_v59 }
 0x1dd   :  { %v537_v61 = vadd.f32 %v711_v54, %v536_v60 }
 0x1df   :  { %v715_v62 = vpop.f32.mrb[8].mxu1  ;;  %v538_v63 = vadd.f32 %v712_v58, %v537_v61 }
 0x1e0   :  { %v437_v0 = vpop.f32.mrb[9].mxu1 }
 0x1e1   :  { %v539_v1 = vadd.f32 %v538_v63, %v437_v0  ;;  %v716_v2 = vpop.f32.mrb[10].mxu1 }
 0x1e2   :  { %v440_v3 = vpop.f32.mrb[11].mxu1 }
 0x1e3   :  { %v540_v4 = vadd.f32 %v539_v1, %v440_v3 }
 0x1e5   :  { %v541_v5 = vadd.f32 %v715_v62, %v540_v4 }
 0x1e7   :  { %v719_v6 = vpop.f32.mrb[12].mxu1  ;;  %v542_v7 = vadd.f32 %v716_v2, %v541_v5 }
 0x1e8   :  { %v453_v8 = vpop.f32.mrb[13].mxu1 }
 0x1e9   :  { %v543_v9 = vadd.f32 %v542_v7, %v453_v8  ;;  %v720_v10 = vpop.f32.mrb[14].mxu1 }
 0x1ea   :  { %v456_v11 = vpop.f32.mrb[15].mxu1 }
 0x1eb   :  { %v544_v12 = vadd.f32 %v543_v9, %v456_v11 }
 0x1ed   :  { %v545_v13 = vadd.f32 %v719_v6, %v544_v12 }
 0x1ef   :  { %v723_v14 = vpop.f32.mrb[16].mxu1  ;;  %v546_v15 = vadd.f32 %v720_v10, %v545_v13 }
 0x1f0   :  { %v469_v16 = vpop.f32.mrb[17].mxu1 }
 0x1f1   :  { %v547_v17 = vadd.f32 %v546_v15, %v469_v16  ;;  %v724_v18 = vpop.f32.mrb[18].mxu1 }
 0x1f2   :  { %v472_v19 = vpop.f32.mrb[19].mxu1 }
 0x1f3   :  { %v548_v20 = vadd.f32 %v547_v17, %v472_v19 }
 0x1f5   :  { %v549_v21 = vadd.f32 %v723_v14, %v548_v20 }
 0x1f7   :  { %v727_v22 = vpop.f32.mrb[20].mxu1  ;;  %v550_v23 = vadd.f32 %v724_v18, %v549_v21 }
 0x1f8   :  { %v485_v24 = vpop.f32.mrb[21].mxu1 }
 0x1f9   :  { %v551_v25 = vadd.f32 %v550_v23, %v485_v24  ;;  %v728_v26 = vpop.f32.mrb[22].mxu1 }
 0x1fa   :  { %v488_v27 = vpop.f32.mrb[23].mxu1 }
 0x1fb   :  { %v552_v28 = vadd.f32 %v551_v25, %v488_v27 }
 0x1fd   :  { %v553_v29 = vadd.f32 %v727_v22, %v552_v28 }
 0x1ff   :  { %v731_v30 = vpop.f32.mrb[24].mxu1  ;;  %v554_v31 = vadd.f32 %v728_v26, %v553_v29 }
 0x200   :  { %v501_v32 = vpop.f32.mrb[25].mxu1 }
 0x201   :  { %v555_v33 = vadd.f32 %v554_v31, %v501_v32  ;;  %v732_v34 = vpop.f32.mrb[26].mxu1 }
 0x202   :  { %v504_v35 = vpop.f32.mrb[27].mxu1 }
 0x203   :  { %v556_v36 = vadd.f32 %v555_v33, %v504_v35 }
 0x205   :  { %v557_v37 = vadd.f32 %v731_v30, %v556_v36 }
 0x207   :  { %v735_v38 = vpop.f32.mrb[28].mxu1  ;;  %v558_v39 = vadd.f32 %v732_v34, %v557_v37 }
 0x208   :  { %v517_v40 = vpop.f32.mrb[29].mxu1 }
 0x209   :  { %v559_v41 = vadd.f32 %v558_v39, %v517_v40  ;;  %v736_v42 = vpop.f32.mrb[30].mxu1 }
 0x20a   :  { %v520_v43 = vpop.f32.mrb[31].mxu1 }
 0x20b   :  { %v560_v44 = vadd.f32 %v559_v41, %v520_v43 }
 0x20d   :  { %v561_v45 = vadd.f32 %v735_v38, %v560_v44 }
 0x20f   :  { %v562_v47 = vadd.f32 %v736_v42, %v561_v45 }
 0x211   :  { %v570_v48 = vmul.f32 %v592_v46, %v562_v47 }
 0x213   :  { %571 = vst [vmem:[%s932_s4] sm:$0xff] %v570_v48 }

</bundles_post_ra>
